<compile_context>
chip_gen: v7x
topology: tpu7x:2x2x1
jax: 0.10.0
libtpu: 0.0.40
codegen_flags: <defaults>
</compile_context>

<pallas_src>
import math

import jax
import jax.numpy as jnp
from jax import lax
from jax.experimental import pallas as pl
from jax.experimental.pallas import tpu as pltpu

# ----------------------------- model dimensions ------------------------------
B = 2          # batch
S = 8          # sequence length
D = 32         # hidden dim
VOCAB = 64     # vocab size
C, H, W = 4, 16, 16
P = C * H * W  # flattened image pixels

LOGIT_SCALE = 1.0 / math.sqrt(D)


# --------------------------------- kernel ------------------------------------
def _clip_loss_kernel(ids_mask_ref, img_ref, emb_proj_ref, w_img_ref, loss_ref):
    packed = ids_mask_ref[...]                            # [B, 2S] int32 (ids | mask)
    ids = packed[:, :S]                                   # [B, S] int32
    mask = packed[:, S:].astype(jnp.float32)              # [B, S] f32

    # masked-mean row weights (fold the 1/denom into the pooling weights)
    denom = jnp.maximum(jnp.sum(mask, axis=1, keepdims=True), 1.0)       # [B, 1]
    w = mask / denom                                                     # [B, S]

    # embedding gather + masked mean pool + text projection as ONE weighted
    # one-hot contraction against the pre-projected table (w_txt folded at init):
    #   pool_w[b, v] = sum_s [ids[b,s] == v] * w[b, s]      -> [B, VOCAB]
    #   t_feat       = pool_w @ emb_proj                     -> [B, D]   (MXU)
    vocab_iota = lax.broadcasted_iota(jnp.int32, (B, S, VOCAB), 2)
    sel = ids[:, :, None] == vocab_iota                                  # [B, S, VOCAB]
    pool_w = jnp.sum(jnp.where(sel, w[:, :, None], 0.0), axis=1)         # [B, VOCAB]
    t_feat = jnp.dot(pool_w, emb_proj_ref[...],
                     preferred_element_type=jnp.float32)                 # [B, D]

    # image projection: bf16 MXU operands, f32 accumulation, natural [P, D] weight
    # (plain K-contraction -> no hidden XLU transpose of the 1024-wide weight)
    img = img_ref[...].astype(jnp.bfloat16)                              # [B, P]
    v_feat = jnp.dot(img, w_img_ref[...],
                     preferred_element_type=jnp.float32)                 # [B, D]

    # similarity logits: contract the feature dim of both (no explicit transpose
    # of the tiny [B, D] v_feat is materialized)
    logits = lax.dot_general(t_feat, v_feat,
                             (((1,), (1,)), ((), ())),
                             preferred_element_type=jnp.float32) * LOGIT_SCALE  # [B, B]

    # positive (diagonal) scores = row-wise dot product (diag(L) == diag(L^T))
    pos = jnp.sum(t_feat * v_feat, axis=1, keepdims=True) * LOGIT_SCALE          # [B, 1]

    # symmetric cross-entropy: row logsumexp (i2t) + column logsumexp (t2i)
    m_r = jnp.max(logits, axis=1, keepdims=True)
    lse_r = jnp.log(jnp.sum(jnp.exp(logits - m_r), axis=1, keepdims=True)) + m_r  # [B, 1]
    m_c = jnp.max(logits, axis=0, keepdims=True)
    lse_c = jnp.log(jnp.sum(jnp.exp(logits - m_c), axis=0, keepdims=True)) + m_c  # [1, B]

    loss = (0.5 * (jnp.sum(lse_r) + jnp.sum(lse_c)) - jnp.sum(pos)) / B
    loss_ref[0, 0] = loss


# --------------------------------- wrapper -----------------------------------
def _forward_impl(params, input_ids, attention_mask, image):
    """Mirror of ModelWrapper.forward: returns {'loss': scalar}."""
    # zero-copy metadata reshape of contiguous NCHW data
    img_flat = image.reshape(image.shape[0], -1)                         # [B, P] f32
    # pack ids + mask into a single tiny int32 block -> one DMA instead of two
    ids_mask = jnp.concatenate(
        [input_ids.astype(jnp.int32), attention_mask.astype(jnp.int32)], axis=1)

    cost = pl.CostEstimate(
        flops=2 * (B * VOCAB * D + B * P * D + 2 * B * B * D) + 4 * B * S * VOCAB,
        transcendentals=2 * B * B + 2,
        bytes_accessed=(ids_mask.size * 4 + img_flat.size * 4
                        + params["emb_proj"].size * 4
                        + params["w_img"].size * 2 + 4),
    )

    vmem = pltpu.MemorySpace.VMEM
    loss2d = pl.pallas_call(
        _clip_loss_kernel,
        out_shape=jax.ShapeDtypeStruct((1, 1), jnp.float32),
        in_specs=[pl.BlockSpec(memory_space=vmem) for _ in range(4)],
        out_specs=pl.BlockSpec(memory_space=pltpu.MemorySpace.SMEM),
        cost_estimate=cost,
    )(ids_mask, img_flat, params["emb_proj"], params["w_img"])

    return {"loss": loss2d[0, 0]}


# single XLA dispatch for reshape + concat + pallas call + scalar extraction
model_wrapper_forward = jax.jit(_forward_impl)


def init_params(key):
    k_emb, k_txt, k_img = jax.random.split(key, 3)
    emb = jax.random.normal(k_emb, (VOCAB, D), jnp.float32) * 0.02
    w_txt = jax.random.normal(k_txt, (D, D), jnp.float32) / math.sqrt(D)
    return {
        # text projection folded into the embedding table (done once at init, f32)
        "emb_proj": emb @ w_txt,                                   # [VOCAB, D] f32
        # natural [P, D] (K x N) layout; bf16 halves the only non-trivial weight DMA
        "w_img": (jax.random.normal(k_img, (P, D), jnp.float32)
                  / math.sqrt(P)).astype(jnp.bfloat16),            # [P, D] bf16
    }


# ----------------------------------- main -------------------------------------
if __name__ == "__main__":
    key = jax.random.PRNGKey(0)
    k_params, k_ids, k_img = jax.random.split(key, 3)

    params = init_params(k_params)

    input_ids = jax.random.randint(k_ids, (B, S), 0, VOCAB, dtype=jnp.int32)
    # deterministic mask: row 0 fully valid, row 1 has last half padded
    attention_mask = jnp.array(
        [[1] * S, [1] * (S // 2) + [0] * (S // 2)], dtype=jnp.int32)
    image = jax.random.normal(k_img, (B, C, H, W), jnp.float32)

    out = model_wrapper_forward(params, input_ids, attention_mask, image)
    loss = jax.block_until_ready(out["loss"])
    assert loss.shape == () and jnp.isfinite(loss)
    print("KERNEL_OK")
</pallas_src>

<mosaic_0001>
module attributes {stable_mosaic.version = 11 : i64} {
  func.func @_clip_loss_kernel(%arg0: memref<2x16xi32, #tpu.memory_space<vmem>>, %arg1: memref<2x1024xf32, #tpu.memory_space<vmem>>, %arg2: memref<64x32xf32, #tpu.memory_space<vmem>>, %arg3: memref<1024x32xbf16, #tpu.memory_space<vmem>>, %arg4: memref<1x1xf32, #tpu.memory_space<smem>>) attributes {dimension_semantics = [], scalar_prefetch = 0 : i64, scratch_operands = 0 : i64, tpu.core_type = #tpu.core_type<tc>} {
    %c0 = arith.constant 0 : index
    %c0_0 = arith.constant 0 : index
    %0 = vector.load %arg0[%c0, %c0_0] : memref<2x16xi32, #tpu.memory_space<vmem>>, vector<2x16xi32>
    %1 = vector.extract_strided_slice %0 {offsets = [0, 0], sizes = [2, 8], strides = [1, 1]} : vector<2x16xi32> to vector<2x8xi32>
    %2 = vector.extract_strided_slice %0 {offsets = [0, 8], sizes = [2, 8], strides = [1, 1]} : vector<2x16xi32> to vector<2x8xi32>
    %3 = arith.sitofp %2 : vector<2x8xi32> to vector<2x8xf32>
    %cst = arith.constant dense<0.000000e+00> : vector<2xf32>
    %4 = vector.multi_reduction <add>, %3, %cst [1] : vector<2x8xf32> to vector<2xf32>
    %5 = vector.shape_cast %4 : vector<2xf32> to vector<2x1xf32>
    %cst_1 = arith.constant 1.000000e+00 : f32
    %6 = vector.broadcast %cst_1 : f32 to vector<2x1xf32>
    %7 = arith.maximumf %5, %6 : vector<2x1xf32>
    %8 = vector.broadcast %7 : vector<2x1xf32> to vector<2x8xf32>
    %9 = arith.divf %3, %8 : vector<2x8xf32>
    %10 = tpu.iota {dimensions = array<i32: 2>} : vector<2x8x64xi32>
    %11 = vector.shape_cast %1 : vector<2x8xi32> to vector<2x8x1xi32>
    %12 = vector.broadcast %11 : vector<2x8x1xi32> to vector<2x8x64xi32>
    %13 = arith.cmpi eq, %12, %10 : vector<2x8x64xi32>
    %14 = vector.shape_cast %9 : vector<2x8xf32> to vector<2x8x1xf32>
    %cst_2 = arith.constant 0.000000e+00 : f32
    %15 = vector.shape_cast %14 : vector<2x8x1xf32> to vector<2x8x1xf32>
    %16 = vector.broadcast %15 : vector<2x8x1xf32> to vector<2x8x64xf32>
    %17 = vector.broadcast %cst_2 : f32 to vector<2x8x64xf32>
    %18 = arith.select %13, %16, %17 : vector<2x8x64xi1>, vector<2x8x64xf32>
    %cst_3 = arith.constant dense<0.000000e+00> : vector<2x64xf32>
    %19 = vector.multi_reduction <add>, %18, %cst_3 [1] : vector<2x8x64xf32> to vector<2x64xf32>
    %c0_4 = arith.constant 0 : index
    %c0_5 = arith.constant 0 : index
    %20 = vector.load %arg2[%c0_4, %c0_5] : memref<64x32xf32, #tpu.memory_space<vmem>>, vector<64x32xf32>
    %cst_6 = arith.constant dense<0.000000e+00> : vector<2x32xf32>
    %21 = tpu.matmul %19, %20, %cst_6 {dimension_numbers = #tpu.dot_dimension_numbers<[1], [0], [0], [1], [0, 0, 1, 1], [], []>} : vector<2x64xf32>, vector<64x32xf32>, vector<2x32xf32> -> vector<2x32xf32>
    %c0_7 = arith.constant 0 : index
    %c0_8 = arith.constant 0 : index
    %22 = vector.load %arg1[%c0_7, %c0_8] : memref<2x1024xf32, #tpu.memory_space<vmem>>, vector<2x1024xf32>
    %23 = arith.truncf %22 : vector<2x1024xf32> to vector<2x1024xbf16>
    %c0_9 = arith.constant 0 : index
    %c0_10 = arith.constant 0 : index
    %24 = vector.load %arg3[%c0_9, %c0_10] : memref<1024x32xbf16, #tpu.memory_space<vmem>>, vector<1024x32xbf16>
    %cst_11 = arith.constant dense<0.000000e+00> : vector<2x32xf32>
    %25 = tpu.matmul %23, %24, %cst_11 {dimension_numbers = #tpu.dot_dimension_numbers<[1], [0], [0], [1], [0, 0, 1, 1], [], []>} : vector<2x1024xbf16>, vector<1024x32xbf16>, vector<2x32xf32> -> vector<2x32xf32>
    %cst_12 = arith.constant dense<0.000000e+00> : vector<2x2xf32>
    %26 = tpu.matmul %21, %25, %cst_12 {dimension_numbers = #tpu.dot_dimension_numbers<[1], [1], [0], [0], [0, 0, 1, 0], [], []>} : vector<2x32xf32>, vector<2x32xf32>, vector<2x2xf32> -> vector<2x2xf32>
    %cst_13 = arith.constant 0.176776692 : f32
    %27 = vector.broadcast %cst_13 : f32 to vector<2x2xf32>
    %28 = arith.mulf %26, %27 : vector<2x2xf32>
    %29 = arith.mulf %21, %25 : vector<2x32xf32>
    %cst_14 = arith.constant dense<0.000000e+00> : vector<2xf32>
    %30 = vector.multi_reduction <add>, %29, %cst_14 [1] : vector<2x32xf32> to vector<2xf32>
    %31 = vector.shape_cast %30 : vector<2xf32> to vector<2x1xf32>
    %cst_15 = arith.constant 0.176776692 : f32
    %32 = vector.broadcast %cst_15 : f32 to vector<2x1xf32>
    %33 = arith.mulf %31, %32 : vector<2x1xf32>
    %cst_16 = arith.constant dense<0xFF800000> : vector<2xf32>
    %34 = vector.multi_reduction <maximumf>, %28, %cst_16 [1] : vector<2x2xf32> to vector<2xf32>
    %35 = vector.shape_cast %34 : vector<2xf32> to vector<2x1xf32>
    %36 = vector.broadcast %35 : vector<2x1xf32> to vector<2x2xf32>
    %37 = arith.subf %28, %36 : vector<2x2xf32>
    %38 = math.exp %37 : vector<2x2xf32>
    %cst_17 = arith.constant dense<0.000000e+00> : vector<2xf32>
    %39 = vector.multi_reduction <add>, %38, %cst_17 [1] : vector<2x2xf32> to vector<2xf32>
    %40 = vector.shape_cast %39 : vector<2xf32> to vector<2x1xf32>
    %41 = math.log %40 : vector<2x1xf32>
    %42 = arith.addf %41, %35 : vector<2x1xf32>
    %cst_18 = arith.constant dense<0xFF800000> : vector<2xf32>
    %43 = vector.multi_reduction <maximumf>, %28, %cst_18 [0] : vector<2x2xf32> to vector<2xf32>
    %44 = vector.shape_cast %43 : vector<2xf32> to vector<1x2xf32>
    %45 = vector.broadcast %44 : vector<1x2xf32> to vector<2x2xf32>
    %46 = arith.subf %28, %45 : vector<2x2xf32>
    %47 = math.exp %46 : vector<2x2xf32>
    %cst_19 = arith.constant dense<0.000000e+00> : vector<2xf32>
    %48 = vector.multi_reduction <add>, %47, %cst_19 [0] : vector<2x2xf32> to vector<2xf32>
    %49 = vector.shape_cast %48 : vector<2xf32> to vector<1x2xf32>
    %50 = math.log %49 : vector<1x2xf32>
    %51 = arith.addf %50, %44 : vector<1x2xf32>
    %52 = vector.shape_cast %42 : vector<2x1xf32> to vector<1x2x1xf32>
    %cst_20 = arith.constant dense<0.000000e+00> : vector<1xf32>
    %53 = vector.multi_reduction <add>, %52, %cst_20 [1, 2] : vector<1x2x1xf32> to vector<1xf32>
    %54 = vector.shape_cast %53 : vector<1xf32> to vector<1x1x1xf32>
    %55 = vector.extract %54[0, 0, 0] : f32 from vector<1x1x1xf32>
    %56 = vector.shape_cast %51 : vector<1x2xf32> to vector<1x1x2xf32>
    %cst_21 = arith.constant dense<0.000000e+00> : vector<1xf32>
    %57 = vector.multi_reduction <add>, %56, %cst_21 [1, 2] : vector<1x1x2xf32> to vector<1xf32>
    %58 = vector.shape_cast %57 : vector<1xf32> to vector<1x1x1xf32>
    %59 = vector.extract %58[0, 0, 0] : f32 from vector<1x1x1xf32>
    %60 = arith.addf %55, %59 : f32
    %cst_22 = arith.constant 5.000000e-01 : f32
    %61 = arith.mulf %cst_22, %60 : f32
    %62 = vector.shape_cast %33 : vector<2x1xf32> to vector<1x2x1xf32>
    %cst_23 = arith.constant dense<0.000000e+00> : vector<1xf32>
    %63 = vector.multi_reduction <add>, %62, %cst_23 [1, 2] : vector<1x2x1xf32> to vector<1xf32>
    %64 = vector.shape_cast %63 : vector<1xf32> to vector<1x1x1xf32>
    %65 = vector.extract %64[0, 0, 0] : f32 from vector<1x1x1xf32>
    %66 = arith.subf %61, %65 : f32
    %cst_24 = arith.constant 2.000000e+00 : f32
    %67 = arith.divf %66, %cst_24 : f32
    %c0_25 = arith.constant 0 : index
    %c0_26 = arith.constant 0 : index
    %68 = memref.load %arg4[%c0_25, %c0_26] : memref<1x1xf32, #tpu.memory_space<smem>>
    memref.store %67, %arg4[%c0_25, %c0_26] : memref<1x1xf32, #tpu.memory_space<smem>>
    return
  }
}

</mosaic_0001>

<bundles_post_ra>
// kernel: _forward_impl.1
= control target key start
LH: loop header
LB: loop body
LE: loop exit
PB: predicated region body
PF: predicated region fallthrough
CT: control target
= control target key end

     0   :  { %s1364_s17 = smov 120   ;;  %s1669_s0 = inlined_call_operand.vmem [shape: s32[2,16], index: 0, kind: input, shape index: {}]   ;;  %s1670_s1 = inlined_call_operand.vmem [shape: f32[2,1024], index: 1, kind: input, shape index: {}]   ;;  %s1671_s2 = inlined_call_operand.vmem [shape: f32[64,32], index: 2, kind: input, shape index: {}]   ;;  %s1672_s3 = inlined_call_operand.vmem [shape: bf16[1024,32], index: 3, kind: input, shape index: {}]   ;;  %s1673_s4 = inlined_call_operand.hbm [shape: f32[1,1], index: 4, kind: output, shape index: {}]  }
   0x1   :  { %v19_v0 = vld [vmem:[%s1669_s0] sm:$0x3] }
   0x2   :  { %v20_v1 = vcvt.s32.f32 %v19_v0 }
   0x4   :  { %22 = vrot.lane.b32.xlu0 %v20_v1, %s1364_s17 }
   0x5   :  { %9 = vsyncpa [#allocation3], 0  ;;  %vm25_vm0 = vcmask 58368   ;;  %v32_v4 = vlaneseq  ;;  %v1276_v10 = vld [vmem:[%s1672_s3 + $0x40] sm:$0xff]   ;;  %v1278_v12 = vld [vmem:[%s1672_s3 + $0x48] sm:$0xff]   ;;  %v1365_v23 = vmov 0.0|0.0  }
   0x6   :  { %v1277_v11 = vld [vmem:[%s1672_s3] sm:$0xff]   ;;  %1138 = vmatprep.subr.bf16.mxu1 %v1276_v10  ;;  %v1279_v13 = vld [vmem:[%s1672_s3 + $0x8] sm:$0xff]   ;;  %v1280_v14 = vld [vmem:[%s1672_s3 + $0x50] sm:$0xff]   ;;  %1252 = vmatprep.subr.bf16.mxu0 %v1365_v23  ;;  %v1366_v36 = vmov 1983009808   ;;  %vm1367_vm1 = vmmov 0  }
   0x7   :  { %v1399_v5 = vshrl.u32 %v32_v4, 7  ;;  %1139 = vmatpush3.bf16.msra.mxu1 %v1277_v11  ;;  %v1281_v15 = vld [vmem:[%s1672_s3 + $0x10] sm:$0xff]   ;;  %v1282_v18 = vld [vmem:[%s1672_s3 + $0x58] sm:$0xff]   ;;  %v83_v20 = vld [vmem:[%s1671_s2] sm:$0xff]  ;;  %v173_v37 = vunpack.c.l.s4 %v1366_v36  ;;  %v1368_v53 = vmov 0.0   ;;  %vm68_vm2 = vcmask 523264  }
   0x8   :  { %1140 = vmatprep.subr.bf16.mxu1 %v1278_v12  ;;  %v1283_v19 = vld [vmem:[%s1672_s3 + $0x18] sm:$0xff]   ;;  %v84_v21 = vld [vmem:[%s1671_s2 + $0x8] sm:$0xff]  ;;  %v1284_v24 = vld [vmem:[%s1672_s3 + $0x60] sm:$0xff]   ;;  %1244 = vmatprep.mubr.msk.f32.mxu0 %vm1367_vm1, %v1368_v53  ;;  %vm93_vm5 = vcmask 1041409   ;;  %vm893_vm6 = vcmask 261120   ;;  %vm977_vm7 = vcmask 9216  }
   0x9   :  { %v36_v6 = vsub.s32 0, %v1399_v5  ;;  %v43_v7 = vsub.s32 1, %v1399_v5  ;;  %v1253_v22 = vpack.c.bf16 %v84_v21, %v83_v20  ;;  %v1285_v25 = vld [vmem:[%s1672_s3 + $0x20] sm:$0xff]   ;;  %v85_v26 = vld [vmem:[%s1671_s2 + $0x10] sm:$0xff]  ;;  %v86_v27 = vld [vmem:[%s1671_s2 + $0x18] sm:$0xff]  ;;  %v174_v41 = vunpack.c.0.s8 %v173_v37  ;;  %s1352_s5 = scalar_lea.hbm %s1673_s4, 16 }
   0xa   :  { %v1256_v28 = vpack.c.bf16 %v86_v27, %v85_v26  ;;  %v1286_v29 = vld [vmem:[%s1672_s3 + $0x68] sm:$0xff]   ;;  %v87_v32 = vld [vmem:[%s1671_s2 + $0x20] sm:$0xff]  ;;  %v1288_v38 = vld [vmem:[%s1672_s3 + $0x70] sm:$0xff]   ;;  %v33_v20 = vand.u32 127, %v32_v4  ;;  %vm972_vm8 = vcmask 254976   ;;  %vm1020_vm9 = vcmask 8192   ;;  %p1353_p0 = scmp.ne.s32.totalorder %s1673_s4, %s1352_s5  ;;  %p1356_p1 = scmp.lt.u32.totalorder %s1352_s5, %s1673_s4 }
   0xb   :  { %v37_v8 = vrot.slane %v19_v0, %v36_v6  ;;  %v44_v9 = vrot.slane %v19_v0, %v43_v7  ;;  %1141 = vmatpush3.bf16.msra.mxu1 %v1279_v13  ;;  %1254 = vmatpush3.bf16.msra.mxu0 %v1253_v22  ;;  %v1287_v30 = vld [vmem:[%s1672_s3 + $0x28] sm:$0xff]   ;;  %v1289_v40 = vld [vmem:[%s1672_s3 + $0x30] sm:$0xff]   ;;  %v90_v43 = vld [vmem:[%s1671_s2 + $0x38] sm:$0xff]  ;;  %v1472_v45 = vsub.s32 %v174_v41, %v1399_v5  ;;  %vm1009_vm10 = vcmask 1024  }
   0xc   :  { %1142 = vmatprep.subr.bf16.mxu1 %v1280_v14  ;;  %1255 = vmatprep.subr.bf16.mxu0 %v1365_v23  ;;  %v88_v33 = vld [vmem:[%s1671_s2 + $0x28] sm:$0xff]  ;;  %v89_v42 = vld [vmem:[%s1671_s2 + $0x30] sm:$0xff]  ;;  %v1290_v46 = vld [vmem:[%s1672_s3 + $0x78] sm:$0xff]   ;;  %p1358_p2 = pnand %p1356_p1, %p1353_p0 }
   0xd   :  { %39 = vbcast.lane.b32.xlu1 %v37_v8, 256  ;;  %v1259_v35 = vpack.c.bf16 %v88_v33, %v87_v32  ;;  %v1262_v44 = vpack.c.bf16 %v90_v43, %v89_v42  ;;  %v167_v47 = vld [vmem:[%s1670_s1] sm:$0xff]  ;;  %v1291_v49 = vld [vmem:[%s1672_s3 + $0x38] sm:$0xff]   ;;  %v1299_v58 = vld [vmem:[%s1672_s3 + $0x148] sm:$0xff]  }
   0xe   :  { %v178_v50 = vrot.slane %v167_v47, %v1472_v45  ;;  %v1292_v51 = vld [vmem:[%s1672_s3 + $0xc0] sm:$0xff]   ;;  %v1300_v59 = vld [vmem:[%s1672_s3 + $0x108] sm:$0xff]   ;;  %v1303_v60 = vld [vmem:[%s1672_s3 + $0x150] sm:$0xff]  }
   0xf   :  { %1143 = vmatpush3.bf16.msra.mxu1 %v1281_v15  ;;  %1257 = vmatpush3.bf16.msra.mxu0 %v1256_v28  ;;  %v1295_v55 = vld [vmem:[%s1672_s3 + $0x140] sm:$0xff]   ;;  %v1304_v61 = vld [vmem:[%s1672_s3 + $0x110] sm:$0xff]   ;;  %v1307_v62 = vld [vmem:[%s1672_s3 + $0x158] sm:$0xff]  }
  0x10   :  { %1144 = vmatprep.subr.bf16.mxu1 %v1282_v18  ;;  %1258 = vmatprep.subr.bf16.mxu0 %v1365_v23  ;;  %v186_v52 = vcombine.high %v178_v50, %v178_v50  ;;  %v213_v56 = vpack.c.bf16 %v178_v50, %v178_v50  ;;  %v1296_v57 = vld [vmem:[%s1672_s3 + $0x100] sm:$0xff]   ;;  %v1308_v63 = vld [vmem:[%s1672_s3 + $0x118] sm:$0xff]   ;;  %v1316_v5 = vld [vmem:[%s1672_s3 + $0x128] sm:$0xff]  }
  0x11   :  { %46 = vbcast.lane.b32.xlu1 %v44_v9, 256  ;;  %v1311_v0 = vld [vmem:[%s1672_s3 + $0x160] sm:$0xff]   ;;  %v168_v9 = vld [vmem:[%s1670_s1 + $0x8] sm:$0xff]  ;;  %v1323_v11 = vld [vmem:[%s1672_s3 + $0x178] sm:$0xff]  }
  0x12   :  { %v214_v54 = vpack.c.bf16 %v186_v52, %v186_v52  ;;  %v195_v10 = vrot.slane %v168_v9, %v1472_v45  ;;  %v1324_v12 = vld [vmem:[%s1672_s3 + $0x138] sm:$0xff]   ;;  %v1297_v41 = vld [vmem:[%s1672_s3 + $0xc8] sm:$0xff]   ;;  %v1317_v52 = vld [vmem:[%s1672_s3 + $0xf0] sm:$0xff]  }
  0x13   :  { %1145 = vmatpush3.bf16.msra.mxu1 %v1283_v19  ;;  %1260 = vmatpush3.bf16.msra.mxu0 %v1259_v35  ;;  %v1298_v43 = vld [vmem:[%s1672_s3 + $0x88] sm:$0xff]  }
  0x14   :  { %1146 = vmatprep.subr.bf16.mxu1 %v1284_v24  ;;  %1261 = vmatprep.subr.bf16.mxu0 %v1365_v23  ;;  %v203_v13 = vcombine.high %v195_v10, %v195_v10  ;;  %v217_v15 = vpack.c.bf16 %v195_v10, %v195_v10  ;;  %v1313_v50 = vld [vmem:[%s1672_s3 + $0xe8] sm:$0xff]   ;;  %v1339_v10 = vld [vmem:[%s1672_s3 + $0x1f8] sm:$0xff]  }
  0x15   :  { %765 = vmatprep.mubr.bf16.mxu1 %v214_v54  ;;  %v1321_v54 = vld [vmem:[%s1672_s3 + $0xf8] sm:$0xff]  }
  0x16   :  { %v218_v14 = vpack.c.bf16 %v203_v13, %v203_v13 }
  0x17   :  { %1147 = vmatpush3.bf16.msra.mxu1 %v1285_v25  ;;  %1263 = vmatpush3.bf16.msra.mxu0 %v1262_v44  ;;  %v1301_v44 = vld [vmem:[%s1672_s3 + $0xd0] sm:$0xff]  }
  0x18   :  { %1148 = vmatprep.subr.bf16.mxu1 %v1286_v29  ;;  %1160 = vmatprep.subr.bf16.mxu0 %v1292_v51  ;;  %v1314_v51 = vld [vmem:[%s1672_s3 + $0xa8] sm:$0xff]  }
  0x1b   :  { %1149 = vmatpush3.bf16.msra.mxu1 %v1287_v30 }
  0x1c   :  { %1150 = vmatprep.subr.bf16.mxu1 %v1288_v38 }
  0x1f   :  { %1151 = vmatpush3.bf16.msra.mxu1 %v1289_v40 }
  0x20   :  { %1152 = vmatprep.subr.bf16.mxu1 %v1290_v46  ;;  %v1305_v46 = vld [vmem:[%s1672_s3 + $0xd8] sm:$0xff]  }
  0x23   :  { %1153 = vmatpush3.bf16.msra.mxu1 %v1291_v49  ;;  %v1310_v49 = vld [vmem:[%s1672_s3 + $0xa0] sm:$0xff]  }
  0x24   :  { %1182 = vmatprep.subr.bf16.mxu1 %v1295_v55  ;;  %v1322_v55 = vld [vmem:[%s1672_s3 + $0xb8] sm:$0xff]  }
  0x26   :  { %766 = vmatmul.mubr.bf16.vlgmr.msra.gmra.mrb[0].mxu1 %v213_v56 }
  0x27   :  { %1183 = vmatpush3.bf16.msra.mxu1 %v1296_v57  ;;  %845 = vmatprep.mubr.bf16.mxu1 %v218_v14  ;;  %v1325_v57 = vld [vmem:[%s1672_s3 + $0x1c0] sm:$0xff]  }
  0x28   :  { %1184 = vmatprep.subr.bf16.mxu1 %v1299_v58 }
  0x2b   :  { %1185 = vmatpush3.bf16.msra.mxu1 %v1300_v59  ;;  %v1326_v59 = vld [vmem:[%s1672_s3 + $0x180] sm:$0xff]  }
  0x2c   :  { %1186 = vmatprep.subr.bf16.mxu1 %v1303_v60 }
  0x2f   :  { %1187 = vmatpush3.bf16.msra.mxu1 %v1304_v61  ;;  %v1327_v61 = vld [vmem:[%s1672_s3 + $0x1c8] sm:$0xff]  }
  0x30   :  { %1188 = vmatprep.subr.bf16.mxu1 %v1307_v62  ;;  %v1328_v62 = vld [vmem:[%s1672_s3 + $0x188] sm:$0xff]  }
  0x33   :  { %1189 = vmatpush3.bf16.msra.mxu1 %v1308_v63  ;;  %v1329_v63 = vld [vmem:[%s1672_s3 + $0x1d0] sm:$0xff]  }
  0x34   :  { %1190 = vmatprep.subr.bf16.mxu1 %v1311_v0  ;;  %v1330_v0 = vld [vmem:[%s1672_s3 + $0x190] sm:$0xff]  }
  0x76   :  { %v23_v2 = vpop.permute.xlu0 %22 }
  0x77   :  { %v26_v3 = vsel %vm25_vm0, %v23_v2, 0.0  ;;  %v1315_v2 = vld [vmem:[%s1672_s3 + $0x168] sm:$0xff]  }
  0x78   :  { %27 = vadd.xlane.f32.xlu0 %v26_v3  ;;  %v171_v3 = vcombine.high %v167_v47, %v167_v47  ;;  %v1306_v47 = vld [vmem:[%s1672_s3 + $0x98] sm:$0xff]  }
  0x7a   :  { %v1533_v8 = vrot.slane %v171_v3, %v1472_v45  ;;  %v1333_v3 = vld [vmem:[%s1672_s3 + $0x1e0] sm:$0xff]  }
  0x7c   :  { %v187_v35 = vcombine.high %v1533_v8, %v1533_v8  ;;  %v215_v58 = vpack.c.bf16 %v1533_v8, %v1533_v8  ;;  %v1337_v8 = vld [vmem:[%s1672_s3 + $0x1f0] sm:$0xff]  }
  0x7e   :  { %v216_v40 = vpack.c.bf16 %v187_v35, %v187_v35 }
  0x7f   :  { %v40_v18 = vpop.permute.xlu1 %39 }
  0x80   :  { %vm48_vm3 = vcmp.eq.s32.totalorder %v40_v18, %v33_v20 }
  0x83   :  { %v47_v19 = vpop.permute.xlu1 %46 }
  0x84   :  { %vm49_vm4 = vcmp.eq.s32.totalorder %v47_v19, %v33_v20 }
  0xf9   :  { %v1154_v13 = vpop.f32.mrb[0].mxu1 }
  0xfa   :  { %v1155_v14 = vpop.f32.mrb[1].mxu1 }
 0x105   :  { %v28_v16 = vpop.xlane.xlu0 %27 }
 0x106   :  { %v29_v17 = vmax.f32 %v28_v16, 1.0  ;;  %v188_v16 = vcombine.high %v168_v9, %v168_v9  ;;  %v1338_v9 = vld [vmem:[%s1672_s3 + $0x1b0] sm:$0xff]  }
 0x108   :  { %1342 = vrcp.f32 %v29_v17  ;;  %v1547_v17 = vrot.slane %v188_v16, %v1472_v45  ;;  %v1302_v45 = vld [vmem:[%s1672_s3 + $0x90] sm:$0xff]   ;;  %v1157_v16 = vpop.f32.mrb[2].mxu1 }
 0x109   :  { %v1158_v18 = vpop.f32.mrb[3].mxu1 }
 0x10a   :  { %v204_v56 = vcombine.high %v1547_v17, %v1547_v17 }
 0x10c   :  { %v220_v60 = vpack.c.bf16 %v204_v56, %v204_v56 }
 0x112   :  { %v1343_v31 = vpop.eup %1342 }
 0x113   :  { %v31_v34 = vmul.f32 %v1343_v31, %v20_v1  ;;  %v1312_v1 = vld [vmem:[%s1672_s3 + $0x120] sm:$0xff]  }
 0x114   :  { %1191 = vmatpush3.bf16.msra.mxu1 %v1312_v1  ;;  %v1331_v1 = vld [vmem:[%s1672_s3 + $0x1d8] sm:$0xff]  }
 0x115   :  { %v53_v39 = vrot.slane %v31_v34, %v36_v6  ;;  %v61_v48 = vrot.slane %v31_v34, %v43_v7  ;;  %1192 = vmatprep.subr.bf16.mxu1 %v1315_v2  ;;  %v1319_v6 = vld [vmem:[%s1672_s3 + $0x170] sm:$0xff]   ;;  %v1332_v2 = vld [vmem:[%s1672_s3 + $0x198] sm:$0xff]  }
 0x116   :  { %v1320_v7 = vld [vmem:[%s1672_s3 + $0x130] sm:$0xff]  }
 0x117   :  { %56 = vbcast.lane.b32.xlu1 %v53_v39, 264  ;;  %v1293_v39 = vld [vmem:[%s1672_s3 + $0x80] sm:$0xff]  }
 0x118   :  { %1193 = vmatpush3.bf16.msra.mxu1 %v1316_v5  ;;  %v1334_v5 = vld [vmem:[%s1672_s3 + $0x1a0] sm:$0xff]  }
 0x119   :  { %1194 = vmatprep.subr.bf16.mxu1 %v1319_v6  ;;  %v1335_v6 = vld [vmem:[%s1672_s3 + $0x1e8] sm:$0xff]  }
 0x11b   :  { %64 = vbcast.lane.b32.xlu1 %v61_v48, 264  ;;  %v1309_v48 = vld [vmem:[%s1672_s3 + $0xe0] sm:$0xff]  }
 0x11c   :  { %1195 = vmatpush3.bf16.msra.mxu1 %v1320_v7  ;;  %v1336_v7 = vld [vmem:[%s1672_s3 + $0x1a8] sm:$0xff]  }
 0x11d   :  { %1196 = vmatprep.subr.bf16.mxu1 %v1323_v11  ;;  %v1340_v11 = vld [vmem:[%s1672_s3 + $0x1b8] sm:$0xff]  }
 0x120   :  { %1197 = vmatpush3.bf16.msra.mxu1 %v1324_v12  ;;  %v219_v12 = vpack.c.bf16 %v1547_v17, %v1547_v17 }
 0x121   :  { %1247 = vmatprep.subr.mxu1 %v1368_v53 }
 0x123   :  { %846 = vmatmul.mubr.bf16.vlgmr.msra.gmra.mrb[4].mxu1 %v217_v15  ;;  %v1156_v15 = vadd.f32 %v1155_v14, %v1154_v13 }
 0x124   :  { %1249 = vmatprep.mubr.msk.f32.mxu1 %vm1367_vm1, %v1368_v53  ;;  %v1318_v53 = vld [vmem:[%s1672_s3 + $0xb0] sm:$0xff]  }
 0x189   :  { %v57_v21 = vpop.permute.xlu1 %56 }
 0x18a   :  { %v66_v22 = vsel %vm48_vm3, %v57_v21, 0.0 }
 0x18b   :  { %v69_v23 = vsel %vm68_vm2, %v66_v22, 0.0 }
 0x18c   :  { %v70_v24 = vrot.slane %v69_v23, 4 }
 0x18d   :  { %v65_v25 = vpop.permute.xlu1 %64 }
 0x18e   :  { %v71_v26 = vadd.f32 %v70_v24, %v69_v23  ;;  %v67_v27 = vsel %vm49_vm4, %v65_v25, 0.0 }
 0x18f   :  { %v76_v28 = vsel %vm68_vm2, %v67_v27, 0.0 }
 0x190   :  { %v72_v29 = vrot.slane %v71_v26, 2  ;;  %v77_v30 = vrot.slane %v76_v28, 4 }
 0x192   :  { %v73_v31 = vadd.f32 %v72_v29, %v71_v26  ;;  %v78_v32 = vadd.f32 %v77_v30, %v76_v28 }
 0x194   :  { %v79_v33 = vrot.slane %v78_v32, 2  ;;  %v74_v34 = vrot.slane %v73_v31, 1 }
 0x196   :  { %v80_v4 = vadd.f32 %v79_v33, %v78_v32  ;;  %v75_v37 = vadd.f32 %v74_v34, %v73_v31 }
 0x198   :  { %v81_v36 = vrot.slane %v80_v4, 1 }
 0x19a   :  { %v82_v38 = vadd.f32 %v81_v36, %v80_v4 }
 0x19c   :  { %v94_v42 = vsel %vm93_vm5, %v82_v38, %v75_v37 }
 0x19d   :  { %1245 = vmatmul.mubr.msk.f32.vlgmr.msra.gmra.mrb[0].mxu0 %vm68_vm2, %v94_v42 }
 0x19e   :  { %1161 = vmatpush3.bf16.msra.mxu0 %v1293_v39  ;;  %805 = vmatprep.mubr.bf16.mxu0 %v216_v40 }
 0x19f   :  { %1162 = vmatprep.subr.bf16.mxu0 %v1297_v41 }
 0x1a2   :  { %1163 = vmatpush3.bf16.msra.mxu0 %v1298_v43 }
 0x1a3   :  { %1164 = vmatprep.subr.bf16.mxu0 %v1301_v44 }
 0x1a6   :  { %1165 = vmatpush3.bf16.msra.mxu0 %v1302_v45 }
 0x1a7   :  { %1166 = vmatprep.subr.bf16.mxu0 %v1305_v46 }
 0x1aa   :  { %1167 = vmatpush3.bf16.msra.mxu0 %v1306_v47 }
 0x1ab   :  { %1168 = vmatprep.subr.bf16.mxu0 %v1309_v48 }
 0x1ae   :  { %1169 = vmatpush3.bf16.msra.mxu0 %v1310_v49 }
 0x1af   :  { %1170 = vmatprep.subr.bf16.mxu0 %v1313_v50 }
 0x1b2   :  { %1171 = vmatpush3.bf16.msra.mxu0 %v1314_v51 }
 0x1b3   :  { %1172 = vmatprep.subr.bf16.mxu0 %v1317_v52 }
 0x1b6   :  { %1173 = vmatpush3.bf16.msra.mxu0 %v1318_v53 }
 0x1b7   :  { %1174 = vmatprep.subr.bf16.mxu0 %v1321_v54 }
 0x1ba   :  { %1175 = vmatpush3.bf16.msra.mxu0 %v1322_v55 }
 0x1bb   :  { %1204 = vmatprep.subr.bf16.mxu0 %v1325_v57 }
 0x1bd   :  { %806 = vmatmul.mubr.bf16.vlgmr.msra.gmra.mrb[4].mxu0 %v215_v58 }
 0x1be   :  { %1205 = vmatpush3.bf16.msra.mxu0 %v1326_v59  ;;  %885 = vmatprep.mubr.bf16.mxu0 %v220_v60 }
 0x1bf   :  { %1206 = vmatprep.subr.bf16.mxu0 %v1327_v61 }
 0x1c2   :  { %1207 = vmatpush3.bf16.msra.mxu0 %v1328_v62 }
 0x1c3   :  { %1208 = vmatprep.subr.bf16.mxu0 %v1329_v63 }
 0x1c6   :  { %1209 = vmatpush3.bf16.msra.mxu0 %v1330_v0 }
 0x1c7   :  { %1210 = vmatprep.subr.bf16.mxu0 %v1331_v1 }
 0x1ca   :  { %1211 = vmatpush3.bf16.msra.mxu0 %v1332_v2 }
 0x1cb   :  { %1212 = vmatprep.subr.bf16.mxu0 %v1333_v3 }
 0x1ce   :  { %1213 = vmatpush3.bf16.msra.mxu0 %v1334_v5 }
 0x1cf   :  { %1214 = vmatprep.subr.bf16.mxu0 %v1335_v6 }
 0x1d2   :  { %1215 = vmatpush3.bf16.msra.mxu0 %v1336_v7 }
 0x1d3   :  { %1216 = vmatprep.subr.bf16.mxu0 %v1337_v8 }
 0x1d6   :  { %1217 = vmatpush3.bf16.msra.mxu0 %v1338_v9 }
 0x1d7   :  { %1218 = vmatprep.subr.bf16.mxu0 %v1339_v10 }
 0x1da   :  { %1219 = vmatpush3.bf16.msra.mxu0 %v1340_v11 }
 0x1dd   :  { %886 = vmatmul.mubr.bf16.vlgmr.msra.gmra.mrb[8].mxu0 %v219_v12 }
 0x1f6   :  { %v1198_v19 = vpop.f32.mrb[4].mxu1 }
 0x1f7   :  { %v1199_v20 = vpop.f32.mrb[5].mxu1 }
 0x1f8   :  { %v1200_v21 = vadd.f32 %v1199_v20, %v1198_v19  ;;  %v1201_v22 = vpop.f32.mrb[6].mxu1 }
 0x1f9   :  { %v1202_v23 = vpop.f32.mrb[7].mxu1 }
 0x270   :  { %v163_v24 = vpop.f32.mrb[0].mxu0 }
 0x271   :  { %v1246_v25 = vpop.f32.mrb[1].mxu0 }
 0x290   :  { %v1176_v26 = vpop.f32.mrb[4].mxu0 }
 0x291   :  { %v1177_v27 = vpop.f32.mrb[5].mxu0 }
 0x292   :  { %v1178_v28 = vadd.f32 %v1177_v27, %v1176_v26  ;;  %v1179_v29 = vpop.f32.mrb[6].mxu0 }
 0x293   :  { %v1180_v30 = vpop.f32.mrb[7].mxu0 }
 0x294   :  { %v808_v17 = vadd.f32 %v1178_v28, %v1156_v15 }
 0x296   :  { %v848_v31 = vadd.f32 %v1200_v21, %v808_v17 }
 0x2b0   :  { %v1220_v32 = vpop.f32.mrb[8].mxu0 }
 0x2b1   :  { %v1221_v33 = vpop.f32.mrb[9].mxu0 }
 0x2b2   :  { %v1222_v34 = vadd.f32 %v1221_v33, %v1220_v32  ;;  %v1223_v4 = vpop.f32.mrb[10].mxu0 }
 0x2b3   :  { %v1224_v35 = vpop.f32.mrb[11].mxu0 }
 0x2b4   :  { %v888_v36 = vadd.f32 %v1222_v34, %v848_v31 }
 0x2b6   :  { %1248 = vmatpush3.xpose.msk.msra.mxu1 %vm893_vm6, %v888_v36  ;;  %v971_v37 = vmul.f32 %v888_v36, %v163_v24 }
 0x2b8   :  { %v973_v1 = vsel %vm972_vm8, %v971_v37, 0.0 }
 0x2b9   :  { %1250 = vmatmul.mubr.msk.f32.vlgmr.msra.gmra.mrb[8].mxu1 %vm893_vm6, %v163_v24 }
 0x38c   :  { %v966_v38 = vpop.f32.mrb[8].mxu1 }
 0x38d   :  { %v970_v39 = vmul.f32 0.17677669, %v966_v38  ;;  %v1251_v40 = vpop.f32.mrb[9].mxu1 }
 0x38f   :  { %v978_v41 = vsel %vm977_vm7, %v970_v39, -inf }
 0x390   :  { %979 = vmax.xlane.f32.xlu1 %v978_v41  ;;  %v990_v42 = vrot.slane %v978_v41, 4 }
 0x392   :  { %v991_v43 = vmax.f32 %v978_v41, %v990_v42 }
 0x394   :  { %v992_v44 = vrot.slane %v991_v43, 2 }
 0x396   :  { %v993_v45 = vmax.f32 %v991_v43, %v992_v44 }
 0x398   :  { %v994_v46 = vrot.slane %v993_v45, 1 }
 0x39a   :  { %v995_v47 = vmax.f32 %v993_v45, %v994_v46 }
 0x39c   :  { %v996_v48 = vsub.f32 %v970_v39, %v995_v47 }
 0x39e   :  { %v997_v49 = vmul.f32 1.442695, %v996_v48 }
 0x3a0   :  { %1344 = vpow2.f32 %v997_v49 }
 0x3aa   :  { %v1345_v50 = vpop.eup %1344 }
 0x3ab   :  { %v999_v51 = vsel %vm977_vm7, %v1345_v50, 0.0 }
 0x3ac   :  { %v1000_v52 = vrot.slane %v999_v51, 4 }
 0x3ae   :  { %v1001_v53 = vadd.f32 %v1000_v52, %v999_v51 }
 0x3b0   :  { %v1002_v54 = vrot.slane %v1001_v53, 2 }
 0x3b2   :  { %v1003_v55 = vadd.f32 %v1002_v54, %v1001_v53 }
 0x3b4   :  { %v1004_v56 = vrot.slane %v1003_v55, 1 }
 0x3b6   :  { %v1005_v57 = vadd.f32 %v1004_v56, %v1003_v55 }
 0x3b8   :  { %1346 = vlog2.f32 %v1005_v57 }
 0x3c2   :  { %v1347_v61 = vpop.eup %1346 }
 0x3c3   :  { %v1007_v0 = vmul.f32 0.6931472, %v1347_v61 }
 0x3c5   :  { %v1008_v2 = vadd.f32 %v1007_v0, %v995_v47 }
 0x3c7   :  { %v1021_v3 = vsel %vm1020_vm9, %v1008_v2, 0.0 }
 0x41d   :  { %v980_v58 = vpop.xlane.xlu1 %979 }
 0x41e   :  { %v981_v59 = vsub.f32 %v970_v39, %v980_v58 }
 0x420   :  { %v982_v60 = vmul.f32 1.442695, %v981_v59 }
 0x422   :  { %1348 = vpow2.f32 %v982_v60 }
 0x42c   :  { %v1349_v62 = vpop.eup %1348 }
 0x42d   :  { %v984_v63 = vsel %vm977_vm7, %v1349_v62, 0.0 }
 0x42e   :  { %985 = vadd.xlane.f32.xlu0 %v984_v63 }
 0x432   :  { %974 = vadd.xlane.f32.xlu0 %v973_v1 }
 0x436   :  { %1022 = vadd.xlane.f32.xlu0 %v1021_v3 }
 0x4bb   :  { %v986_v5 = vpop.xlane.xlu0 %985 }
 0x4bc   :  { %1350 = vlog2.f32 %v986_v5 }
 0x4bf   :  { %v975_v8 = vpop.xlane.xlu0 %974 }
 0x4c0   :  { %v976_v10 = vmul.f32 0.17677669, %v975_v8 }
 0x4c2   :  { %v1033_v12 = vsel %vm1009_vm10, %v976_v10, 0.0 }
 0x4c3   :  { %v1023_v13 = vpop.xlane.xlu0 %1022 }
 0x4c4   :  { %v1024_v14 = vrot.slane %v1023_v13, 4 }
 0x4c6   :  { %v1351_v6 = vpop.eup %1350  ;;  %v1025_v15 = vadd.f32 %v1024_v14, %v1023_v13 }
 0x4c7   :  { %v988_v7 = vmul.f32 0.6931472, %v1351_v6 }
 0x4c8   :  { %v1026_v16 = vrot.slane %v1025_v15, 2 }
 0x4c9   :  { %v989_v9 = vadd.f32 %v988_v7, %v980_v58 }
 0x4ca   :  { %v1027_v22 = vadd.f32 %v1026_v16, %v1025_v15 }
 0x4cb   :  { %v1010_v11 = vsel %vm1009_vm10, %v989_v9, 0.0 }
 0x4cc   :  { %1011 = vadd.xlane.f32.xlu0 %v1010_v11  ;;  %v1028_v27 = vrot.slane %v1027_v22, 1 }
 0x4ce   :  { %v1029_v31 = vadd.f32 %v1028_v27, %v1027_v22 }
 0x4d0   :  { %1034 = vadd.xlane.f32.xlu0 %v1033_v12 }
 0x559   :  { %v1012_v18 = vpop.xlane.xlu0 %1011 }
 0x55a   :  { %v1013_v19 = vrot.slane %v1012_v18, 4 }
 0x55c   :  { %v1014_v20 = vadd.f32 %v1013_v19, %v1012_v18 }
 0x55d   :  { %v1035_v21 = vpop.xlane.xlu0 %1034 }
 0x55e   :  { %v1015_v23 = vrot.slane %v1014_v20, 2  ;;  %v1036_v24 = vrot.slane %v1035_v21, 4 }
 0x560   :  { %v1037_v25 = vadd.f32 %v1036_v24, %v1035_v21  ;;  %v1016_v26 = vadd.f32 %v1015_v23, %v1014_v20 }
 0x562   :  { %v1038_v28 = vrot.slane %v1037_v25, 2  ;;  %v1017_v29 = vrot.slane %v1016_v26, 1 }
 0x564   :  { %v1039_v30 = vadd.f32 %v1038_v28, %v1037_v25  ;;  %v1018_v17 = vadd.f32 %v1017_v29, %v1016_v26 }
 0x566   :  { %1264 = vpush %v1018_v17  ;;  %v1040_v32 = vrot.slane %v1039_v30, 1 }
 0x567   :  { %1266 = vpush %v1029_v31 }
 0x568   :  { %v1041_v33 = vadd.f32 %v1040_v32, %v1039_v30 }
 0x56a   :  { %1268 = vpush %v1041_v33 }
 0x597   :  { %s1265_s3 = spop %1264 }
 0x598   :  { %s1267_s23 = spop %1266 }
 0x599   :  { %s1031_s24 = sadd.f32 %s1267_s23, %s1265_s3 }
 0x59b   :  { %s1032_s25 = smul.f32 0.5, %s1031_s24  ;;  %s1269_s26 = spop %1268 }
 0x59d   :  { %s1043_s27 = ssub.f32 %s1032_s25, %s1269_s26 }
 0x59f   :  { %s1046_s28 = smul.f32 0.5, %s1043_s27 }
 0x5a1   :  { %1048 = sst [smem:[#allocation2]] %s1046_s28 }
 0x5a2   :  { %1361 = shalt.err (!%p1358_p2)
}
 0x5a3   :  { %s1369_s10 = smov [#allocation2]  }
 0x5a4   :  { %1056 = dma.smem_to_hbm %s1369_s10, 16, %s1673_s4, [#allocation3]  }
 0x5a5   :  { %1362 = dma.done.wait [#allocation3], 16  }
 0x5a6   :  { %1363 = vsyncadd [#allocation3], 4294967280 }
 0x5a7   :  { %1060 = sfence }
 0x5a8   :  { %1061 = vsyncpa [#allocation3], 1 }

</bundles_post_ra>
